<compile_context>
chip_gen: v7x
topology: tpu7x:2x2x1
jax: 0.10.0
libtpu: 0.0.40
codegen_flags: <defaults>
</compile_context>

<pallas_src>
import functools

import jax
import jax.numpy as jnp
from jax.experimental import pallas as pl
from jax.experimental.pallas import tpu as pltpu

LN_EPS = 1e-5  # PyTorch nn.LayerNorm default


def _round_up(v: int, m: int) -> int:
    return ((v + m - 1) // m) * m


@functools.lru_cache(maxsize=None)
def _vmem_capacity_bytes() -> int:
    try:
        return int(pltpu.get_tpu_info().vmem_capacity_bytes)
    except Exception:
        return 64 << 20  # conservative fallback (v7x-sized VMEM)


def _plan_tiles(M, Dp, x_itemsize, mxu_itemsize):
    """Pick (TM, TN, weight_buffer_count, vmem_limit_bytes)."""
    cap = _vmem_capacity_bytes()
    budget = max(cap - (8 << 20), 24 << 20)

    def usage(tm, tn, w_bufs):
        return (2 * tm * Dp * x_itemsize            # double-buffered x blocks
                + 2 * tm * tn * x_itemsize          # double-buffered out blocks
                + w_bufs * Dp * tn * mxu_itemsize   # weight tile(s)
                + 2 * Dp * 4 + 2 * tn * 4           # gamma / beta / bias
                + tm * Dp * mxu_itemsize            # cached y scratch
                + 3 * tm * Dp * 4)                  # live f32 LN temporaries

    def finish(tm, tn, w_bufs):
        lim = usage(tm, tn, w_bufs) + (4 << 20)
        lim = int(min(max(lim, 32 << 20), cap - (2 << 20)))
        return tm, tn, w_bufs, lim

    # Row-tile candidates (multiples of 8). Prefer >= 2 row blocks when M
    # allows so both TensorCores get work under ("parallel", ...) semantics.
    max_tm = _round_up(M, 8)
    if M > 8:
        max_tm = min(max_tm, _round_up(pl.cdiv(M, 2), 8))
    tms = [t for t in (1024, 512, 256, 128, 64, 32, 16, 8) if t <= max_tm]

    # Preferred path: full weight resident in VMEM (single column tile,
    # single-buffered), with the largest row tile that fits.
    for tm in tms:
        if usage(tm, Dp, 1) <= budget:
            return finish(tm, Dp, 1)
    # Fallback (large D vs small VMEM, e.g. v7x): stream W column tiles
    # (double-buffered over the j grid axis), LN result cached across j.
    for tn in (1024, 512, 256, 128):
        if Dp % tn:
            continue
        for tm in tms:
            if usage(tm, tn, 2) <= budget:
                return finish(tm, tn, 2)
    return finish(8, 128, 2)


def prenorm_linear_kernel(x_ref, gamma_ref, beta_ref, w_ref, b_ref, o_ref,
                          y_ref, *, d_true):
    """Row-tile i, weight-column-tile j:
         j == 0:  y = LayerNorm(x_i) * gamma + beta   (cached in y_ref)
         all j :  o[i, j] = y @ W[:, j] + b[j]
    The feature dim may be zero-padded from d_true up to Dp (128-lane aligned);
    LayerNorm statistics use the true d_true features only.
    """

    @pl.when(pl.program_id(1) == 0)
    def _():
        x = x_ref[...].astype(jnp.float32)            # (TM, Dp) — LN math in f32
        dp = x.shape[-1]
        inv_d = jnp.float32(1.0 / d_true)
        # Padded lanes of x are zero, so the sum (mean) is already exact.
        mean = jnp.sum(x, axis=-1, keepdims=True) * inv_d
        centered = x - mean
        if d_true != dp:
            # Cheap (1, Dp) lane mask (broadcast in the where); only the
            # variance statistic needs it.
            lane = jax.lax.broadcasted_iota(jnp.int32, (1, dp), dimension=1)
            centered = jnp.where(lane < d_true, centered, 0.0)
        var = jnp.sum(centered * centered, axis=-1, keepdims=True) * inv_d
        # Fold the per-row rsqrt scale and gamma into one factor — no separate
        # xn intermediate is materialized.
        scale = jax.lax.rsqrt(var + LN_EPS) * gamma_ref[...].astype(jnp.float32)
        y = centered * scale + beta_ref[...].astype(jnp.float32)
        y_ref[...] = y.astype(y_ref.dtype)

    # fn = Linear on the MXU: operands in the MXU dtype, f32 accumulation.
    out = jnp.dot(y_ref[...], w_ref[...], preferred_element_type=jnp.float32)
    o_ref[...] = (out + b_ref[...].astype(jnp.float32)).astype(o_ref.dtype)


@functools.partial(jax.jit, static_argnames=("mxu_dtype",))
def prenorm_forward(x, gamma, beta, w, b, *, mxu_dtype=None):
    """x: (B, N, D).  Returns fn(LayerNorm(x)) with fn = Linear(D, D)."""
    B, N, D = x.shape
    M = B * N
    out_dtype = x.dtype
    mxu_dtype = jnp.dtype(out_dtype if mxu_dtype is None else mxu_dtype)
    x_itemsize = jnp.dtype(x.dtype).itemsize

    Dp = _round_up(D, 128)
    TM, TN, w_bufs, vmem_limit = _plan_tiles(M, Dp, x_itemsize, mxu_dtype.itemsize)
    grid = (pl.cdiv(M, TM), Dp // TN)
    resident_w = grid[1] == 1

    # Feature-dim (lane) padding only when D is not 128-aligned. The row dim
    # is NOT padded: Pallas handles the partial last row block, and LayerNorm
    # and the matmul are row-independent, so garbage rows in the padded read
    # never contaminate valid rows and are never written back.
    x2 = x.reshape(M, D)
    if Dp != D:
        pad = ((0, 0), (0, Dp - D))
        x2 = jnp.pad(x2, pad)
        gamma2 = jnp.pad(gamma.reshape(1, D), pad)
        beta2 = jnp.pad(beta.reshape(1, D), pad)
        b2 = jnp.pad(b.reshape(1, D), pad)
        w2 = jnp.pad(w, ((0, Dp - D), (0, Dp - D)))
    else:
        gamma2 = gamma.reshape(1, D)
        beta2 = beta.reshape(1, D)
        b2 = b.reshape(1, D)
        w2 = w
    w2 = w2.astype(mxu_dtype)  # one-time MXU-operand cast

    # Grid-invariant operands: single-buffered (their index_map is constant,
    # double-buffering would only double their VMEM footprint).
    gamma_spec = pl.BlockSpec((1, Dp), lambda i, j: (0, 0),
                              pipeline_mode=pl.Buffered(1))
    beta_spec = pl.BlockSpec((1, Dp), lambda i, j: (0, 0),
                             pipeline_mode=pl.Buffered(1))
    if resident_w:
        w_spec = pl.BlockSpec((Dp, TN), lambda i, j: (0, j),
                              pipeline_mode=pl.Buffered(1))
        b_spec = pl.BlockSpec((1, TN), lambda i, j: (0, j),
                              pipeline_mode=pl.Buffered(1))
    else:
        # W column tiles streamed over grid axis j (default double-buffering).
        w_spec = pl.BlockSpec((Dp, TN), lambda i, j: (0, j))
        b_spec = pl.BlockSpec((1, TN), lambda i, j: (0, j))

    cost = pl.CostEstimate(
        flops=2 * M * Dp * Dp + 8 * M * Dp,
        transcendentals=M,
        bytes_accessed=(2 * M * Dp * x_itemsize
                        + Dp * Dp * int(mxu_dtype.itemsize)),
    )

    kernel = functools.partial(prenorm_linear_kernel, d_true=D)
    out = pl.pallas_call(
        kernel,
        out_shape=jax.ShapeDtypeStruct((M, Dp), out_dtype),
        grid=grid,
        in_specs=[
            pl.BlockSpec((TM, Dp), lambda i, j: (i, 0)),   # x row tile (pipelined over i)
            gamma_spec,                                    # gamma (VMEM-resident)
            beta_spec,                                     # beta  (VMEM-resident)
            w_spec,                                        # W (resident or streamed)
            b_spec,                                        # bias
        ],
        out_specs=pl.BlockSpec((TM, TN), lambda i, j: (i, j)),
        scratch_shapes=[pltpu.VMEM((TM, Dp), mxu_dtype)],  # cached y = LN(x)*g+b
        compiler_params=pltpu.CompilerParams(
            dimension_semantics=("parallel", "arbitrary"),
            vmem_limit_bytes=vmem_limit,
        ),
        cost_estimate=cost,
    )(x2, gamma2, beta2, w2, b2)

    if Dp != D:
        out = out[:, :D]
    return out.reshape(B, N, D)


def reference_forward(x, gamma, beta, w, b):
    xf = x.astype(jnp.float32)
    mean = jnp.mean(xf, axis=-1, keepdims=True)
    var = jnp.mean((xf - mean) ** 2, axis=-1, keepdims=True)
    y = (xf - mean) / jnp.sqrt(var + LN_EPS) * gamma.astype(jnp.float32) \
        + beta.astype(jnp.float32)
    return (y @ w.astype(jnp.float32) + b.astype(jnp.float32)).astype(x.dtype)


# TODO(synk): PreNorm.fn is an arbitrary wrapped callable in the PyTorch
# module; a representative Linear(dim, dim) is fused here. Other fn's would be
# fused the same way after the cached-y LayerNorm stage.

if __name__ == "__main__":
    # --- Test 1: f32, batch=2, seq=8, hidden=32 (lane-padded feature dim). ---
    B, N, D = 2, 8, 32
    key = jax.random.PRNGKey(0)
    kx, kw, kb = jax.random.split(key, 3)

    x = jax.random.normal(kx, (B, N, D), dtype=jnp.float32)
    gamma = jnp.ones((D,), dtype=jnp.float32)   # PyTorch LayerNorm default init
    beta = jnp.zeros((D,), dtype=jnp.float32)
    w = jax.random.normal(kw, (D, D), dtype=jnp.float32) * 0.05
    b = jax.random.normal(kb, (D,), dtype=jnp.float32) * 0.01

    out = prenorm_forward(x, gamma, beta, w, b)
    jax.block_until_ready(out)
    ref = reference_forward(x, gamma, beta, w, b)
    assert out.shape == (B, N, D)
    assert jnp.allclose(out, ref, atol=1e-4, rtol=1e-4), "f32 mismatch vs reference"

    # --- Test 2: bf16 fast path, D=256 (no pad), M not divisible by the row
    #             tile (exercises the partial last block, no row padding). ----
    B2, N2, D2 = 2, 100, 256
    k1, k2, k3, k4 = jax.random.split(jax.random.PRNGKey(1), 4)
    xb = jax.random.normal(k1, (B2, N2, D2), dtype=jnp.float32).astype(jnp.bfloat16)
    gb = 1.0 + 0.1 * jax.random.normal(k2, (D2,), dtype=jnp.float32)
    bb = 0.1 * jax.random.normal(k3, (D2,), dtype=jnp.float32)
    wb = jax.random.normal(k4, (D2, D2), dtype=jnp.float32) * (1.0 / 16.0)
    bias2 = jnp.zeros((D2,), dtype=jnp.float32)

    out2 = prenorm_forward(xb, gb, bb, wb, bias2)
    jax.block_until_ready(out2)
    ref2 = reference_forward(xb, gb, bb, wb, bias2)
    err = jnp.max(jnp.abs(out2.astype(jnp.float32) - ref2.astype(jnp.float32)))
    assert out2.shape == (B2, N2, D2)
    assert float(err) < 0.15, f"bf16 mismatch vs reference: {float(err)}"

    print("KERNEL_OK")
</pallas_src>

<mosaic_0001>
module attributes {stable_mosaic.version = 11 : i64} {
  func.func @prenorm_linear_kernel(%arg0: i32, %arg1: i32, %arg2: memref<8x128xf32, #tpu.memory_space<vmem>>, %arg3: memref<1x128xf32, #tpu.memory_space<vmem>>, %arg4: memref<1x128xf32, #tpu.memory_space<vmem>>, %arg5: memref<128x128xf32, #tpu.memory_space<vmem>>, %arg6: memref<1x128xf32, #tpu.memory_space<vmem>>, %arg7: memref<8x128xf32, #tpu.memory_space<vmem>>, %arg8: memref<8x128xf32, #tpu.memory_space<vmem>>) attributes {dimension_semantics = [#tpu.dimension_semantics<parallel>, #tpu.dimension_semantics<arbitrary>], iteration_bounds = array<i64: 2, 1>, scalar_prefetch = 0 : i64, scratch_operands = 1 : i64, tpu.core_type = #tpu.core_type<tc>, window_params = [{transform_indices = @transform_0, window_bounds = array<i64: 8, 128>}, {pipeline_mode = #tpu.pipeline_mode<synchronous>, transform_indices = @transform_1, window_bounds = array<i64: 1, 128>}, {pipeline_mode = #tpu.pipeline_mode<synchronous>, transform_indices = @transform_2, window_bounds = array<i64: 1, 128>}, {pipeline_mode = #tpu.pipeline_mode<synchronous>, transform_indices = @transform_3, window_bounds = array<i64: 128, 128>}, {pipeline_mode = #tpu.pipeline_mode<synchronous>, transform_indices = @transform_4, window_bounds = array<i64: 1, 128>}, {transform_indices = @transform_5, window_bounds = array<i64: 8, 128>}]} {
    %c0_i32 = arith.constant 0 : i32
    %0 = arith.cmpi eq, %arg1, %c0_i32 : i32
    %1 = arith.extui %0 : i1 to i32
    %c0_i32_0 = arith.constant 0 : i32
    %2 = arith.cmpi ne, %1, %c0_i32_0 : i32
    scf.if %2 {
      %c0_8 = arith.constant 0 : index
      %c0_9 = arith.constant 0 : index
      %10 = vector.load %arg2[%c0_8, %c0_9] : memref<8x128xf32, #tpu.memory_space<vmem>>, vector<8x128xf32>
      %cst_10 = arith.constant dense<0.000000e+00> : vector<8xf32>
      %11 = vector.multi_reduction <add>, %10, %cst_10 [1] : vector<8x128xf32> to vector<8xf32>
      %12 = vector.shape_cast %11 : vector<8xf32> to vector<8x1xf32>
      %cst_11 = arith.constant 3.125000e-02 : f32
      %13 = vector.broadcast %cst_11 : f32 to vector<8x1xf32>
      %14 = arith.mulf %12, %13 : vector<8x1xf32>
      %15 = vector.broadcast %14 : vector<8x1xf32> to vector<8x128xf32>
      %16 = arith.subf %10, %15 : vector<8x128xf32>
      %17 = tpu.iota {dimensions = array<i32: 1>} : vector<1x128xi32>
      %c32_i32 = arith.constant 32 : i32
      %18 = vector.broadcast %c32_i32 : i32 to vector<1x128xi32>
      %19 = arith.cmpi slt, %17, %18 : vector<1x128xi32>
      %cst_12 = arith.constant 0.000000e+00 : f32
      %20 = vector.shape_cast %19 : vector<1x128xi1> to vector<1x128xi1>
      %21 = vector.broadcast %20 : vector<1x128xi1> to vector<8x128xi1>
      %22 = vector.broadcast %cst_12 : f32 to vector<8x128xf32>
      %23 = arith.select %21, %16, %22 : vector<8x128xi1>, vector<8x128xf32>
      %24 = arith.mulf %23, %23 : vector<8x128xf32>
      %cst_13 = arith.constant dense<0.000000e+00> : vector<8xf32>
      %25 = vector.multi_reduction <add>, %24, %cst_13 [1] : vector<8x128xf32> to vector<8xf32>
      %26 = vector.shape_cast %25 : vector<8xf32> to vector<8x1xf32>
      %cst_14 = arith.constant 3.125000e-02 : f32
      %27 = vector.broadcast %cst_14 : f32 to vector<8x1xf32>
      %28 = arith.mulf %26, %27 : vector<8x1xf32>
      %cst_15 = arith.constant 9.99999974E-6 : f32
      %29 = vector.broadcast %cst_15 : f32 to vector<8x1xf32>
      %30 = arith.addf %28, %29 : vector<8x1xf32>
      %31 = math.rsqrt %30 : vector<8x1xf32>
      %c0_16 = arith.constant 0 : index
      %c0_17 = arith.constant 0 : index
      %32 = vector.load %arg3[%c0_16, %c0_17] : memref<1x128xf32, #tpu.memory_space<vmem>>, vector<1x128xf32>
      %33 = vector.broadcast %31 : vector<8x1xf32> to vector<8x128xf32>
      %34 = vector.broadcast %32 : vector<1x128xf32> to vector<8x128xf32>
      %35 = arith.mulf %33, %34 : vector<8x128xf32>
      %36 = arith.mulf %23, %35 : vector<8x128xf32>
      %c0_18 = arith.constant 0 : index
      %c0_19 = arith.constant 0 : index
      %37 = vector.load %arg4[%c0_18, %c0_19] : memref<1x128xf32, #tpu.memory_space<vmem>>, vector<1x128xf32>
      %38 = vector.broadcast %37 : vector<1x128xf32> to vector<8x128xf32>
      %39 = arith.addf %36, %38 : vector<8x128xf32>
      %c0_20 = arith.constant 0 : index
      %c0_21 = arith.constant 0 : index
      %40 = vector.load %arg8[%c0_20, %c0_21] : memref<8x128xf32, #tpu.memory_space<vmem>>, vector<8x128xf32>
      tpu.vector_store %arg8[%c0_20, %c0_21], %39 {strides = array<i32>} : memref<8x128xf32, #tpu.memory_space<vmem>>, vector<8x128xf32>,
    } else {
    }
    %c0 = arith.constant 0 : index
    %c0_1 = arith.constant 0 : index
    %3 = vector.load %arg8[%c0, %c0_1] : memref<8x128xf32, #tpu.memory_space<vmem>>, vector<8x128xf32>
    %c0_2 = arith.constant 0 : index
    %c0_3 = arith.constant 0 : index
    %4 = vector.load %arg5[%c0_2, %c0_3] : memref<128x128xf32, #tpu.memory_space<vmem>>, vector<128x128xf32>
    %cst = arith.constant dense<0.000000e+00> : vector<8x128xf32>
    %5 = tpu.matmul %3, %4, %cst {dimension_numbers = #tpu.dot_dimension_numbers<[1], [0], [0], [1], [0, 0, 1, 1], [], []>} : vector<8x128xf32>, vector<128x128xf32>, vector<8x128xf32> -> vector<8x128xf32>
    %c0_4 = arith.constant 0 : index
    %c0_5 = arith.constant 0 : index
    %6 = vector.load %arg6[%c0_4, %c0_5] : memref<1x128xf32, #tpu.memory_space<vmem>>, vector<1x128xf32>
    %7 = vector.broadcast %6 : vector<1x128xf32> to vector<8x128xf32>
    %8 = arith.addf %5, %7 : vector<8x128xf32>
    %c0_6 = arith.constant 0 : index
    %c0_7 = arith.constant 0 : index
    %9 = vector.load %arg7[%c0_6, %c0_7] : memref<8x128xf32, #tpu.memory_space<vmem>>, vector<8x128xf32>
    tpu.vector_store %arg7[%c0_6, %c0_7], %8 {strides = array<i32>} : memref<8x128xf32, #tpu.memory_space<vmem>>, vector<8x128xf32>,
    return
  }
  func.func @transform_0(%arg0: i32, %arg1: i32) -> (i32, i32) {
    %c0_i32 = arith.constant 0 : i32
    %c0_i32_0 = arith.constant 0 : i32
    return %arg0, %c0_i32 : i32, i32
  }
  func.func @transform_1(%arg0: i32, %arg1: i32) -> (i32, i32) {
    %c0_i32 = arith.constant 0 : i32
    %c0_i32_0 = arith.constant 0 : i32
    %c0_i32_1 = arith.constant 0 : i32
    return %c0_i32, %c0_i32_0 : i32, i32
  }
  func.func @transform_2(%arg0: i32, %arg1: i32) -> (i32, i32) {
    %c0_i32 = arith.constant 0 : i32
    %c0_i32_0 = arith.constant 0 : i32
    %c0_i32_1 = arith.constant 0 : i32
    return %c0_i32, %c0_i32_0 : i32, i32
  }
  func.func @transform_3(%arg0: i32, %arg1: i32) -> (i32, i32) {
    %c0_i32 = arith.constant 0 : i32
    %c0_i32_0 = arith.constant 0 : i32
    return %c0_i32, %arg1 : i32, i32
  }
  func.func @transform_4(%arg0: i32, %arg1: i32) -> (i32, i32) {
    %c0_i32 = arith.constant 0 : i32
    %c0_i32_0 = arith.constant 0 : i32
    return %c0_i32, %arg1 : i32, i32
  }
  func.func @transform_5(%arg0: i32, %arg1: i32) -> (i32, i32) {
    %c0_i32 = arith.constant 0 : i32
    return %arg0, %arg1 : i32, i32
  }
}

</mosaic_0001>

<bundles_post_ra>
// kernel: prenorm_forward.1
= control target key start
LH: loop header
LB: loop body
LE: loop exit
PB: predicated region body
PF: predicated region fallthrough
CT: control target
= control target key end

     0   :  { %s680_s18 = smov 0   ;;  %s682_s19 = smov 0   ;;  %s777_s0 = inlined_call_operand.vmem [shape: f32[16,128], index: 0, kind: input, shape index: {}]   ;;  %s778_s1 = inlined_call_operand.vmem [shape: f32[1,128], index: 1, kind: input, shape index: {}]   ;;  %s779_s2 = inlined_call_operand.vmem [shape: f32[1,128], index: 2, kind: input, shape index: {}]   ;;  %s780_s3 = inlined_call_operand.vmem [shape: f32[128,128], index: 3, kind: input, shape index: {}]   ;;  %s781_s4 = inlined_call_operand.vmem [shape: f32[1,128], index: 4, kind: input, shape index: {}]   ;;  %s782_s5 = inlined_call_operand.vmem [shape: f32[16,128], index: 5, kind: output, shape index: {}]  }
   0x1   :  { %s684_s20 = smov 0  }
   0x2 LB: > { %s27_s21 = sadd.s32 1, %s641_s19  ;;  %p510_p0 = scmp.ge.s32.totalorder %s645_s20, 1  ;;  %s645_s20 = sphi %s684_s20, %s15_s20   ;;  %s641_s19 = sphi %s682_s19, %s784_s19   ;;  %s637_s18 = sphi %s680_s18, %s783_s18  }
   0x3   : > { %p29_p1 = scmp.ge.s32.totalorder %s27_s21, 2  ;;  %p217_p2 = scmp.lt.s32.totalorder %s645_s20, 3 }
   0x5   : > { %s786_s21 = smov (%p29_p1, %s27_s21), 0  ;;  %p218_p3 = pnand %p510_p0, %p217_p2 }
   0x6   : > { %p253_p4 = scmp.lt.s32.totalorder (!%p218_p3), %s637_s18, 1  ;;  %v311_v1 = vld [vmem:[%s780_s3] sm:$0xff] (!%p218_p3)  ;;  %v312_v2 = vld [vmem:[%s780_s3 + $0x8] sm:$0xff] (!%p218_p3)  ;;  %v313_v3 = vld [vmem:[%s780_s3 + $0x10] sm:$0xff] (!%p218_p3)  ;;  %v647_v4 = vmov (!%p218_p3), 0.0|0.0   ;;  %v280_v11 = vlaneseq (!%p218_p3)  ;;  %vm648_vm1 = vmmov (!%p218_p3), 0  }
   0x7   : > { %221 = sbr.rel (%p218_p3) target bundleno = 545 (0x221), region = 40  ;;  %570 = vmatprep.subr.bf16.mxu0 (!%p218_p3), %v647_v4  ;;  %v571_v5 = vpack.c.bf16 (!%p218_p3), %v312_v2, %v311_v1  ;;  %v314_v6 = vld [vmem:[%s780_s3 + $0x18] sm:$0xff] (!%p218_p3)  ;;  %v315_v8 = vld [vmem:[%s780_s3 + $0x20] sm:$0xff] (!%p218_p3)  ;;  %v316_v9 = vld [vmem:[%s780_s3 + $0x28] sm:$0xff] (!%p218_p3)  ;;  %v649_v26 = vmov (!%p218_p3), 0.0  }
   0x8   : > { %v574_v7 = vpack.c.bf16 (!%p218_p3), %v314_v6, %v313_v3  ;;  %v577_v10 = vpack.c.bf16 (!%p218_p3), %v316_v9, %v315_v8  ;;  %v281_v12 = vand.u32 (!%p218_p3), 127, %v280_v11  ;;  %v317_v18 = vld [vmem:[%s780_s3 + $0x30] sm:$0xff] (!%p218_p3)  ;;  %v318_v19 = vld [vmem:[%s780_s3 + $0x38] sm:$0xff] (!%p218_p3)  ;;  %v319_v21 = vld [vmem:[%s780_s3 + $0x40] sm:$0xff] (!%p218_p3)  ;;  %567 = vmatprep.mubr.msk.f32.mxu0 (!%p218_p3), %vm648_vm1, %v649_v26 }
   0x9   : > { %572 = vmatpush3.bf16.msra.mxu0 (!%p218_p3), %v571_v5  ;;  %v580_v20 = vpack.c.bf16 (!%p218_p3), %v318_v19, %v317_v18  ;;  %v320_v22 = vld [vmem:[%s780_s3 + $0x48] sm:$0xff] (!%p218_p3)  ;;  %v321_v24 = vld [vmem:[%s780_s3 + $0x50] sm:$0xff] (!%p218_p3)  ;;  %v322_v25 = vld [vmem:[%s780_s3 + $0x58] sm:$0xff] (!%p218_p3) }
   0xa   : > { %573 = vmatprep.subr.bf16.mxu0 (!%p218_p3), %v647_v4  ;;  %vm282_vm0 = vcmp.lt.s32.totalorder (!%p218_p3), %v281_v12, 32  ;;  %v583_v23 = vpack.c.bf16 (!%p218_p3), %v320_v22, %v319_v21  ;;  %v586_v27 = vpack.c.bf16 (!%p218_p3), %v322_v25, %v321_v24  ;;  %v323_v28 = vld [vmem:[%s780_s3 + $0x60] sm:$0xff] (!%p218_p3)  ;;  %v324_v29 = vld [vmem:[%s780_s3 + $0x68] sm:$0xff] (!%p218_p3)  ;;  %v325_v31 = vld [vmem:[%s780_s3 + $0x70] sm:$0xff] (!%p218_p3) }
   0xb   : > { %v589_v30 = vpack.c.bf16 (!%p218_p3), %v324_v29, %v323_v28  ;;  %v326_v32 = vld [vmem:[%s780_s3 + $0x78] sm:$0xff] (!%p218_p3)  ;;  %v513_v37 = vld [vmem:[%s778_s1] ss:$0 sm:$0xff] (!%p218_p3) }
   0xc   : > { %v592_v33 = vpack.c.bf16 (!%p218_p3), %v326_v32, %v325_v31  ;;  %v514_v40 = vld [vmem:[%s779_s2] ss:$0 sm:$0xff] (!%p218_p3) }
   0xd   : > { %575 = vmatpush3.bf16.msra.mxu0 (!%p218_p3), %v574_v7  ;;  %v515_v43 = vld [vmem:[%s781_s4] ss:$0 sm:$0xff] (!%p218_p3) }
   0xe   : > { %s788_s18 = smov (!%p253_p4, %s637_s18), 1  ;;  %576 = vmatprep.subr.bf16.mxu0 %v647_v4 }
   0xf   : > { %s511_s22 = sshll.u32 %s788_s18, 3 }
  0x10   : > { %s256_s25 = scalar_lea.vmem %s777_s0, %s511_s22  ;;  %s270_s26 = scalar_lea.vmem %s782_s5, %s511_s22 }
  0x11   : > { %v275_v0 = vld [vmem:[%s256_s25] sm:$0xff]  ;;  %578 = vmatpush3.bf16.msra.mxu0 %v577_v10 }
  0x12   : > { %276 = vadd.xlane.f32.xlu0 %v275_v0  ;;  %579 = vmatprep.subr.bf16.mxu0 %v647_v4 }
  0x15   : > { %581 = vmatpush3.bf16.msra.mxu0 %v580_v20 }
  0x16   : > { %582 = vmatprep.subr.bf16.mxu0 %v647_v4 }
  0x19   : > { %584 = vmatpush3.bf16.msra.mxu0 %v583_v23 }
  0x1a   : > { %585 = vmatprep.subr.bf16.mxu0 %v647_v4 }
  0x1d   : > { %587 = vmatpush3.bf16.msra.mxu0 %v586_v27 }
  0x1e   : > { %588 = vmatprep.subr.bf16.mxu0 %v647_v4 }
  0x21   : > { %590 = vmatpush3.bf16.msra.mxu0 %v589_v30 }
  0x22   : > { %591 = vmatprep.subr.bf16.mxu0 %v647_v4 }
  0x25   : > { %593 = vmatpush3.bf16.msra.mxu0 %v592_v33 }
  0x9f   : > { %v277_v13 = vpop.xlane.xlu0 %276 }
  0xa0   : > { %v278_v14 = vmul.f32 0.03125, %v277_v13 }
  0xa2   : > { %v279_v15 = vsub.f32 %v275_v0, %v278_v14 }
  0xa4   : > { %v285_v16 = vsel %vm282_vm0, %v279_v15, 0.0 }
  0xa5   : > { %v286_v17 = vmul.f32 %v285_v16, %v285_v16 }
  0xa7   : > { %287 = vadd.xlane.f32.xlu0 %v286_v17 }
 0x134   : > { %v288_v34 = vpop.xlane.xlu0 %287 }
 0x135   : > { %v289_v35 = vmul.f32 0.03125, %v288_v34 }
 0x137   : > { %v290_v36 = vadd.f32 1e-05, %v289_v35 }
 0x139   : > { %621 = vrsqrt.f32 %v290_v36 }
 0x143   : > { %v622_v38 = vpop.eup %621 }
 0x144   : > { %v299_v39 = vmul.f32 %v622_v38, %v513_v37 }
 0x146   : > { %v300_v41 = vmul.f32 %v299_v39, %v285_v16 }
 0x148   : > { %v308_v42 = vadd.f32 %v514_v40, %v300_v41 }
 0x14a   : > { %568 = vmatmul.mubr.f32.vlgmr.msra.gmra.mrb[0].mxu0 %v308_v42 }
 0x21d   : > { %v400_v44 = vpop.f32.mrb[0].mxu0 }
 0x21e   : > { %v401_v45 = vadd.f32 %v515_v43, %v400_v44  ;;  %v569_v46 = vpop.f32.mrb[1].mxu0 }
 0x220   : > { %404 = vst [vmem:[%s270_s26] sm:$0xff] %v401_v45 }
 0x221 PF: > { %s15_s20 = sadd.s32 1, %s645_s20   ;;  %s783_s18 = smov %s641_s19 }
 0x222   : > { %p12_p5 = scmp.ge.s32.totalorder %s15_s20, 4   ;;  %s784_s19 = smov %s786_s21 }
 0x224   :  { %14 = sbr.rel (!%p12_p5) target bundleno = 2 (0x2), region = 80 }

</bundles_post_ra>
